<compile_context>
chip_gen: v5e
topology: v5e:2x2
jax: 0.10.0
libtpu: 0.0.40
codegen_flags: <defaults>
</compile_context>

<pallas_src>
import numpy as np
import jax
import jax.numpy as jnp
from jax import lax
from jax.experimental import pallas as pl
from jax.experimental.pallas import tpu as pltpu

_VMEM_LIMIT = 32 * 1024 * 1024   # >= default scoped VMEM on v5e (16 MiB); == default on v6e/v7x
# Set to jnp.bfloat16 on v6e/v7x for the high-rate MXU path (2-4x matmul throughput, half the
# VMEM/HBM bytes); kept fp32 here so the self-check tolerances stay tight on every generation.
_MXU_DTYPE = jnp.float32


# ----------------------------------------------------------------------------
# Fused modality-alignment kernel (avg_pool & conv1d modes).
# One pallas_call aligns every modality that needs it:
#   out_m[b, l, :] = sum_s W_m[l, s] * x_m[b, s, :]
# grid=(B,) is "parallel"; x / out keep the native (B, S, D) / (B, L, D) layout (lane-dense D);
# each weight has a constant index_map -> one DMA, VMEM-resident across all grid steps.
# ----------------------------------------------------------------------------
def _make_fused_align_kernel(n):
    def kernel(*refs):
        w_refs = refs[:n]
        x_refs = refs[n:2 * n]
        o_refs = refs[2 * n:]
        for w_ref, x_ref, o_ref in zip(w_refs, x_refs, o_refs):
            w = w_ref[...].astype(_MXU_DTYPE)                       # (L, S_m)
            x = x_ref[0].astype(_MXU_DTYPE)                         # (S_m, D_m)
            out = jnp.dot(w, x, preferred_element_type=jnp.float32)  # (L, D_m)
            o_ref[0] = out.astype(o_ref.dtype)
    return kernel


def fused_seq_align(pairs):
    """pairs: list of (w[L, S_m], x[B, S_m, D_m]) -> list of out[B, L, D_m]; ONE pallas_call."""
    n = len(pairs)
    if n == 0:
        return []
    b = pairs[0][1].shape[0]
    ws = [w.astype(jnp.float32) for w, _ in pairs]
    xs = [x for _, x in pairs]
    in_specs = (
        [pl.BlockSpec(w.shape, lambda i: (0, 0)) for w in ws]                   # resident weights
        + [pl.BlockSpec((1,) + x.shape[1:], lambda i: (i, 0, 0)) for x in xs]   # per-batch slices
    )
    out_specs = tuple(pl.BlockSpec((1, w.shape[0], x.shape[2]), lambda i: (i, 0, 0))
                      for w, x in pairs)
    out_shape = tuple(jax.ShapeDtypeStruct((b, w.shape[0], x.shape[2]), x.dtype)
                      for w, x in pairs)
    outs = pl.pallas_call(
        _make_fused_align_kernel(n),
        out_shape=out_shape,
        grid_spec=pltpu.PrefetchScalarGridSpec(
            num_scalar_prefetch=0,
            grid=(b,),
            in_specs=in_specs,
            out_specs=out_specs,
        ),
        compiler_params=pltpu.CompilerParams(
            dimension_semantics=("parallel",),
            vmem_limit_bytes=_VMEM_LIMIT,
        ),
    )(*ws, *xs)
    return jax.tree_util.tree_leaves(outs)


# ----------------------------------------------------------------------------
# avg_pool mode: pooling expressed as a constant (dst_len, src_len) averaging matrix
#   out[b, l, :] = mean_p x_padded[b, p*dst_len + l, :]   (padding repeats the last frame)
# Built once in __init__ (depends only on src_len / dst_len).
# ----------------------------------------------------------------------------
def _build_pool_matrix(src_len, dst_len):
    pool = src_len // dst_len if src_len % dst_len == 0 else src_len // dst_len + 1
    mat = np.zeros((dst_len, src_len), np.float32)
    for p in range(pool):
        for l in range(dst_len):
            mat[l, min(p * dst_len + l, src_len - 1)] += 1.0 / pool
    return jnp.asarray(mat)


# ----------------------------------------------------------------------------
# ctc mode: fused 2-layer LSTM recurrence + softmax + blank-drop + probs^T @ x, grid=(S,).
# Per grid step (one timestep): layer-1 / layer-2 LSTM cell updates on VMEM-resident h/c,
# softmax over the (dst_len+1) logits, and a rank-1 accumulate into the output accumulator.
# ----------------------------------------------------------------------------
def _fused_ctc_kernel(xp_ref, xt_ref, whh1_ref, wih2_ref, whh2_ref, b2_ref,
                      out_ref, h1, c1, h2, c2, acc):
    t = pl.program_id(0)

    @pl.when(t == 0)
    def _init():
        h1[...] = jnp.zeros_like(h1)
        c1[...] = jnp.zeros_like(c1)
        h2[...] = jnp.zeros_like(h2)
        c2[...] = jnp.zeros_like(c2)
        acc[...] = jnp.zeros_like(acc)

    def rec(h, w_ref, k):
        # h: (B, Hin) times w_ref[k]: (Hout, Hin) transposed -> (B, Hout)  (PyTorch h @ W^T chunk)
        return lax.dot_general(
            h.astype(_MXU_DTYPE), w_ref[k].astype(_MXU_DTYPE),
            dimension_numbers=(((1,), (1,)), ((), ())),
            preferred_element_type=jnp.float32)

    xp = xp_ref[0]                          # (4, B, H): hoisted x @ W_ih1^T + b_ih1 + b_hh1
    h1v, c1v = h1[...], c1[...]
    # layer-1 gates, PyTorch order [i, f, g, o]; gate index is a leading dim -> no lane slicing
    gi = xp[0] + rec(h1v, whh1_ref, 0)
    gf = xp[1] + rec(h1v, whh1_ref, 1)
    gg = xp[2] + rec(h1v, whh1_ref, 2)
    go = xp[3] + rec(h1v, whh1_ref, 3)
    c1n = jax.nn.sigmoid(gf) * c1v + jax.nn.sigmoid(gi) * jnp.tanh(gg)
    h1n = jax.nn.sigmoid(go) * jnp.tanh(c1n)
    h1[...] = h1n
    c1[...] = c1n

    h2v, c2v = h2[...], c2[...]
    gi2 = rec(h1n, wih2_ref, 0) + b2_ref[0] + rec(h2v, whh2_ref, 0)
    gf2 = rec(h1n, wih2_ref, 1) + b2_ref[1] + rec(h2v, whh2_ref, 1)
    gg2 = rec(h1n, wih2_ref, 2) + b2_ref[2] + rec(h2v, whh2_ref, 2)
    go2 = rec(h1n, wih2_ref, 3) + b2_ref[3] + rec(h2v, whh2_ref, 3)
    c2n = jax.nn.sigmoid(gf2) * c2v + jax.nn.sigmoid(gi2) * jnp.tanh(gg2)
    h2n = jax.nn.sigmoid(go2) * jnp.tanh(c2n)
    h2[...] = h2n
    c2[...] = c2n

    # softmax over the (dst_len + 1) logits (approx reciprocal -> EUP slot), then a rank-1
    # accumulate of the pseudo-aligned output:  acc[b, h, :] += probs[b, h] * x_t[b, :]
    m = jnp.max(h2n, axis=-1, keepdims=True)
    e = jnp.exp(h2n - m)
    probs = e * pl.reciprocal(jnp.sum(e, axis=-1, keepdims=True), approx=True)   # (B, H)
    x_t = xt_ref[0].astype(jnp.float32)                                          # (B, D)
    acc[...] += probs[:, :, None] * x_t[:, None, :]                              # (B, H, D)

    @pl.when(t == pl.num_programs(0) - 1)
    def _finalize():
        out_ref[...] = acc[...][:, 1:, :].astype(out_ref.dtype)   # drop blank once, at the end


def ctc_module_forward(params, x):
    """CTCModule forward: logits = 2-layer LSTM(x); out = softmax(logits)[:, :, 1:]^T @ x."""
    b, s, d = x.shape
    p1, p2 = params
    hidden = p1["w_hh"].shape[0] // 4           # = dst_len + 1
    dst_len = hidden - 1

    # Hoist the time-invariant layer-1 input projection out of the recurrence: one XLA GEMM,
    # laid out time-major & per-gate (S, 4, B, H) so the kernel streams full (B, H) blocks.
    w_ih1_g = p1["w_ih"].reshape(4, hidden, d)
    b1 = (p1["b_ih"] + p1["b_hh"]).reshape(4, 1, hidden)
    xp = jnp.einsum("bsi,khi->skbh", x, w_ih1_g) + b1[None]          # (S, 4, B, H)
    x_sbd = jnp.swapaxes(x, 0, 1)                                    # (S, B, D) time-major stream

    whh1 = p1["w_hh"].reshape(4, hidden, hidden)
    wih2 = p2["w_ih"].reshape(4, hidden, hidden)
    whh2 = p2["w_hh"].reshape(4, hidden, hidden)
    b2 = (p2["b_ih"] + p2["b_hh"]).reshape(4, 1, hidden)

    # TODO(synk): for very large batches on v7x, add a leading "parallel" batch-block grid axis
    # (block a multiple of 8) in front of the time axis to shard across the two TensorCores.
    return pl.pallas_call(
        _fused_ctc_kernel,
        out_shape=jax.ShapeDtypeStruct((b, dst_len, d), x.dtype),
        grid_spec=pltpu.PrefetchScalarGridSpec(
            num_scalar_prefetch=0,
            grid=(s,),                                                     # sequential recurrence
            in_specs=[
                pl.BlockSpec((1, 4, b, hidden), lambda t: (t, 0, 0, 0)),   # x_proj, streamed
                pl.BlockSpec((1, b, d), lambda t: (t, 0, 0)),              # x_t, streamed
                pl.BlockSpec((4, hidden, hidden), lambda t: (0, 0, 0)),    # W_hh layer 1 (resident)
                pl.BlockSpec((4, hidden, hidden), lambda t: (0, 0, 0)),    # W_ih layer 2 (resident)
                pl.BlockSpec((4, hidden, hidden), lambda t: (0, 0, 0)),    # W_hh layer 2 (resident)
                pl.BlockSpec((4, 1, hidden), lambda t: (0, 0, 0)),         # layer-2 bias (resident)
            ],
            out_specs=pl.BlockSpec((b, dst_len, d), lambda t: (0, 0, 0)),  # written at last step
            scratch_shapes=[
                pltpu.VMEM((b, hidden), jnp.float32),      # h1
                pltpu.VMEM((b, hidden), jnp.float32),      # c1
                pltpu.VMEM((b, hidden), jnp.float32),      # h2
                pltpu.VMEM((b, hidden), jnp.float32),      # c2
                pltpu.VMEM((b, hidden, d), jnp.float32),   # output accumulator (incl. blank row)
            ],
        ),
        compiler_params=pltpu.CompilerParams(
            dimension_semantics=("arbitrary",),
            vmem_limit_bytes=_VMEM_LIMIT,
        ),
    )(xp, x_sbd, whh1, wih2, whh2, b2)


def _init_lstm_params(key, in_dim, hidden, num_layers=2):
    params = []
    scale = 1.0 / jnp.sqrt(hidden)
    for layer in range(num_layers):
        d_in = in_dim if layer == 0 else hidden
        key, k1, k2, k3, k4 = jax.random.split(key, 5)
        params.append(dict(
            w_ih=jax.random.uniform(k1, (4 * hidden, d_in), jnp.float32, -scale, scale),
            w_hh=jax.random.uniform(k2, (4 * hidden, hidden), jnp.float32, -scale, scale),
            b_ih=jax.random.uniform(k3, (4 * hidden,), jnp.float32, -scale, scale),
            b_hh=jax.random.uniform(k4, (4 * hidden,), jnp.float32, -scale, scale),
        ))
    return params


# ----------------------------------------------------------------------------
# AlignSubNet
# ----------------------------------------------------------------------------
class AlignSubNetPallas:
    def __init__(self, feature_dims, seq_lens, mode, key):
        assert mode in ("avg_pool", "ctc", "conv1d")
        in_dim_t, in_dim_a, in_dim_v = feature_dims
        seq_len_t, seq_len_a, seq_len_v = seq_lens
        self.dst_len = seq_len_t
        self.mode = mode
        self.seq_lens = (seq_len_t, seq_len_a, seq_len_v)
        self._pool_mats = {}
        if mode == "conv1d":
            k1, k2, k3 = jax.random.split(key, 3)
            # nn.Conv1d(seq_len, dst_len, kernel_size=1, bias=False) weight squeezed to 2D
            self.w_t = 0.1 * jax.random.normal(k1, (self.dst_len, seq_len_t), jnp.float32)
            self.w_a = 0.1 * jax.random.normal(k2, (self.dst_len, seq_len_a), jnp.float32)
            self.w_v = 0.1 * jax.random.normal(k3, (self.dst_len, seq_len_v), jnp.float32)
            self.conv_ws = (self.w_t, self.w_a, self.w_v)
        elif mode == "ctc":
            k1, k2, k3 = jax.random.split(key, 3)
            self.ctc_t = _init_lstm_params(k1, in_dim_t, self.dst_len + 1)
            self.ctc_a = _init_lstm_params(k2, in_dim_a, self.dst_len + 1)
            self.ctc_v = _init_lstm_params(k3, in_dim_v, self.dst_len + 1)
            self.ctc_params = (self.ctc_t, self.ctc_a, self.ctc_v)
        else:  # avg_pool: pooling matrices depend only on (src_len, dst_len) -> build once
            for s in self.seq_lens:
                if s != self.dst_len:
                    self._pool_mats[s] = _build_pool_matrix(s, self.dst_len)

    def get_seq_len(self):
        return self.dst_len

    def _get_pool_matrix(self, src_len):
        if src_len not in self._pool_mats:
            self._pool_mats[src_len] = _build_pool_matrix(src_len, self.dst_len)
        return self._pool_mats[src_len]

    def _avg_pool(self, t, a, v):
        xs = [t, a, v]
        idx = [i for i, x in enumerate(xs) if x.shape[1] != self.dst_len]
        pairs = [(self._get_pool_matrix(xs[i].shape[1]), xs[i]) for i in idx]
        for i, o in zip(idx, fused_seq_align(pairs)):
            xs[i] = o
        return tuple(xs)

    def _conv1d(self, t, a, v):
        # TODO(synk): upstream PyTorch feeds text_x into conv1d_A/conv1d_V (a shape bug that
        # raises whenever seq lens differ); here each conv is applied to its own modality,
        # which is the only executable semantics.
        xs = [t, a, v]
        idx = [i for i, x in enumerate(xs) if x.shape[1] != self.dst_len]
        pairs = [(self.conv_ws[i], xs[i]) for i in idx]
        for i, o in zip(idx, fused_seq_align(pairs)):
            xs[i] = o
        return tuple(xs)

    def _ctc(self, t, a, v):
        xs = [t, a, v]
        for i, p in enumerate(self.ctc_params):
            if xs[i].shape[1] != self.dst_len:
                xs[i] = ctc_module_forward(p, xs[i])
        return tuple(xs)

    def __call__(self, text_x, audio_x, video_x):
        if text_x.shape[1] == audio_x.shape[1] == video_x.shape[1]:
            return text_x, audio_x, video_x
        return {"avg_pool": self._avg_pool,
                "conv1d": self._conv1d,
                "ctc": self._ctc}[self.mode](text_x, audio_x, video_x)


# ----------------------------------------------------------------------------
# pure-JAX references (for correctness check)
# ----------------------------------------------------------------------------
def ref_avg_pool(x, dst_len):
    b, s, d = x.shape
    if s == dst_len:
        return x
    if s % dst_len == 0:
        pad_len, pool = 0, s // dst_len
    else:
        pad_len, pool = dst_len - s % dst_len, s // dst_len + 1
    pad_x = jnp.broadcast_to(x[:, -1:, :], (b, pad_len, d))
    xx = jnp.concatenate([x, pad_x], axis=1).reshape(b, pool, dst_len, d)
    return xx.mean(axis=1)


def ref_conv1d(x, w):
    return jnp.einsum("ls,bsd->bld", w, x)


def _ref_lstm_layer(x, w_ih, w_hh, b_ih, b_hh):
    bsz, _, _ = x.shape
    hdim = w_hh.shape[1]

    def step(carry, xt):
        h, c = carry
        gates = xt @ w_ih.T + b_ih + h @ w_hh.T + b_hh
        i, f, g, o = jnp.split(gates, 4, axis=-1)
        i = jax.nn.sigmoid(i)
        f = jax.nn.sigmoid(f)
        g = jnp.tanh(g)
        o = jax.nn.sigmoid(o)
        c = f * c + i * g
        h = o * jnp.tanh(c)
        return (h, c), h

    h0 = jnp.zeros((bsz, hdim), x.dtype)
    c0 = jnp.zeros((bsz, hdim), x.dtype)
    _, hs = lax.scan(step, (h0, c0), jnp.swapaxes(x, 0, 1))
    return jnp.swapaxes(hs, 0, 1)


def ref_ctc(lstm_params, x):
    h = x
    for p in lstm_params:
        h = _ref_lstm_layer(h, p["w_ih"], p["w_hh"], p["b_ih"], p["b_hh"])
    probs = jax.nn.softmax(h, axis=2)[:, :, 1:]
    return jnp.einsum("bsl,bsd->bld", probs, x)


if __name__ == "__main__":
    key = jax.random.PRNGKey(0)
    feature_dims = (32, 16, 24)      # (text, audio, video) feature dims
    seq_lens = (8, 20, 24)           # dst_len = 8; audio needs padding, video divides evenly
    B = 2

    k_t, k_a, k_v, k_params = jax.random.split(key, 4)
    text_x = jax.random.normal(k_t, (B, seq_lens[0], feature_dims[0]), jnp.float32)
    audio_x = jax.random.normal(k_a, (B, seq_lens[1], feature_dims[1]), jnp.float32)
    video_x = jax.random.normal(k_v, (B, seq_lens[2], feature_dims[2]), jnp.float32)

    # --- avg_pool mode ---
    net_pool = AlignSubNetPallas(feature_dims, seq_lens, "avg_pool", k_params)
    t0, a0, v0 = net_pool(text_x, audio_x, video_x)
    jax.block_until_ready((t0, a0, v0))
    assert jnp.allclose(t0, text_x)
    assert jnp.allclose(a0, ref_avg_pool(audio_x, 8), atol=1e-5)
    assert jnp.allclose(v0, ref_avg_pool(video_x, 8), atol=1e-5)

    # --- conv1d mode ---
    net_conv = AlignSubNetPallas(feature_dims, seq_lens, "conv1d", k_params)
    t1, a1, v1 = net_conv(text_x, audio_x, video_x)
    jax.block_until_ready((t1, a1, v1))
    assert jnp.allclose(t1, text_x)
    assert jnp.allclose(a1, ref_conv1d(audio_x, net_conv.w_a), atol=1e-4)
    assert jnp.allclose(v1, ref_conv1d(video_x, net_conv.w_v), atol=1e-4)

    # --- ctc mode --- (approx softmax reciprocal on the EUP -> slightly looser tolerance)
    net_ctc = AlignSubNetPallas(feature_dims, seq_lens, "ctc", k_params)
    t2, a2, v2 = net_ctc(text_x, audio_x, video_x)
    jax.block_until_ready((t2, a2, v2))
    assert jnp.allclose(t2, text_x)
    assert jnp.allclose(a2, ref_ctc(net_ctc.ctc_a, audio_x), atol=1e-2)
    assert jnp.allclose(v2, ref_ctc(net_ctc.ctc_v, video_x), atol=1e-2)

    assert t0.shape == (B, 8, 32) and a0.shape == (B, 8, 16) and v0.shape == (B, 8, 24)
    assert a2.shape == (B, 8, 16) and v2.shape == (B, 8, 24)
    print("KERNEL_OK")
</pallas_src>

<mosaic_0001>
module attributes {stable_mosaic.version = 11 : i64} {
  func.func @kernel(%arg0: i32, %arg1: memref<8x20xf32, #tpu.memory_space<vmem>>, %arg2: memref<8x24xf32, #tpu.memory_space<vmem>>, %arg3: memref<1x20x16xf32, #tpu.memory_space<vmem>>, %arg4: memref<1x24x24xf32, #tpu.memory_space<vmem>>, %arg5: memref<1x8x16xf32, #tpu.memory_space<vmem>>, %arg6: memref<1x8x24xf32, #tpu.memory_space<vmem>>) attributes {dimension_semantics = [#tpu.dimension_semantics<parallel>], iteration_bounds = array<i64: 2>, scalar_prefetch = 0 : i64, scratch_operands = 0 : i64, tpu.core_type = #tpu.core_type<tc>, window_params = [{pipeline_mode = #tpu.pipeline_mode<synchronous>, transform_indices = @transform_0, window_bounds = array<i64: 8, 20>}, {pipeline_mode = #tpu.pipeline_mode<synchronous>, transform_indices = @transform_1, window_bounds = array<i64: 8, 24>}, {transform_indices = @transform_2, window_bounds = array<i64: 1, 20, 16>}, {transform_indices = @transform_3, window_bounds = array<i64: 1, 24, 24>}, {transform_indices = @transform_4, window_bounds = array<i64: 1, 8, 16>}, {transform_indices = @transform_5, window_bounds = array<i64: 1, 8, 24>}]} {
    %c0 = arith.constant 0 : index
    %c0_0 = arith.constant 0 : index
    %0 = vector.load %arg1[%c0, %c0_0] : memref<8x20xf32, #tpu.memory_space<vmem>>, vector<8x20xf32>
    %c0_1 = arith.constant 0 : index
    %c0_2 = arith.constant 0 : index
    %c0_3 = arith.constant 0 : index
    %1 = vector.load %arg3[%c0_1, %c0_2, %c0_3] : memref<1x20x16xf32, #tpu.memory_space<vmem>>, vector<1x20x16xf32>
    %2 = vector.shape_cast %1 : vector<1x20x16xf32> to vector<20x16xf32>
    %cst = arith.constant dense<0.000000e+00> : vector<8x16xf32>
    %3 = tpu.matmul %0, %2, %cst {dimension_numbers = #tpu.dot_dimension_numbers<[1], [0], [0], [1], [0, 0, 1, 1], [], []>} : vector<8x20xf32>, vector<20x16xf32>, vector<8x16xf32> -> vector<8x16xf32>
    %c0_4 = arith.constant 0 : index
    %c0_5 = arith.constant 0 : index
    %c0_6 = arith.constant 0 : index
    %4 = vector.load %arg5[%c0_4, %c0_5, %c0_6] : memref<1x8x16xf32, #tpu.memory_space<vmem>>, vector<1x8x16xf32>
    %5 = vector.shape_cast %4 : vector<1x8x16xf32> to vector<8x16xf32>
    %6 = vector.shape_cast %3 : vector<8x16xf32> to vector<1x8x16xf32>
    tpu.vector_store %arg5[%c0_4, %c0_5, %c0_6], %6 {strides = array<i32>} : memref<1x8x16xf32, #tpu.memory_space<vmem>>, vector<1x8x16xf32>,
    %c0_7 = arith.constant 0 : index
    %c0_8 = arith.constant 0 : index
    %7 = vector.load %arg2[%c0_7, %c0_8] : memref<8x24xf32, #tpu.memory_space<vmem>>, vector<8x24xf32>
    %c0_9 = arith.constant 0 : index
    %c0_10 = arith.constant 0 : index
    %c0_11 = arith.constant 0 : index
    %8 = vector.load %arg4[%c0_9, %c0_10, %c0_11] : memref<1x24x24xf32, #tpu.memory_space<vmem>>, vector<1x24x24xf32>
    %9 = vector.shape_cast %8 : vector<1x24x24xf32> to vector<24x24xf32>
    %cst_12 = arith.constant dense<0.000000e+00> : vector<8x24xf32>
    %10 = tpu.matmul %7, %9, %cst_12 {dimension_numbers = #tpu.dot_dimension_numbers<[1], [0], [0], [1], [0, 0, 1, 1], [], []>} : vector<8x24xf32>, vector<24x24xf32>, vector<8x24xf32> -> vector<8x24xf32>
    %c0_13 = arith.constant 0 : index
    %c0_14 = arith.constant 0 : index
    %c0_15 = arith.constant 0 : index
    %11 = vector.load %arg6[%c0_13, %c0_14, %c0_15] : memref<1x8x24xf32, #tpu.memory_space<vmem>>, vector<1x8x24xf32>
    %12 = vector.shape_cast %11 : vector<1x8x24xf32> to vector<8x24xf32>
    %13 = vector.shape_cast %10 : vector<8x24xf32> to vector<1x8x24xf32>
    tpu.vector_store %arg6[%c0_13, %c0_14, %c0_15], %13 {strides = array<i32>} : memref<1x8x24xf32, #tpu.memory_space<vmem>>, vector<1x8x24xf32>,
    return
  }
  func.func @transform_0(%arg0: i32) -> (i32, i32) {
    %c0_i32 = arith.constant 0 : i32
    %c0_i32_0 = arith.constant 0 : i32
    %c0_i32_1 = arith.constant 0 : i32
    return %c0_i32, %c0_i32_0 : i32, i32
  }
  func.func @transform_1(%arg0: i32) -> (i32, i32) {
    %c0_i32 = arith.constant 0 : i32
    %c0_i32_0 = arith.constant 0 : i32
    %c0_i32_1 = arith.constant 0 : i32
    return %c0_i32, %c0_i32_0 : i32, i32
  }
  func.func @transform_2(%arg0: i32) -> (i32, i32, i32) {
    %c0_i32 = arith.constant 0 : i32
    %c0_i32_0 = arith.constant 0 : i32
    %c0_i32_1 = arith.constant 0 : i32
    return %arg0, %c0_i32, %c0_i32_0 : i32, i32, i32
  }
  func.func @transform_3(%arg0: i32) -> (i32, i32, i32) {
    %c0_i32 = arith.constant 0 : i32
    %c0_i32_0 = arith.constant 0 : i32
    %c0_i32_1 = arith.constant 0 : i32
    return %arg0, %c0_i32, %c0_i32_0 : i32, i32, i32
  }
  func.func @transform_4(%arg0: i32) -> (i32, i32, i32) {
    %c0_i32 = arith.constant 0 : i32
    %c0_i32_0 = arith.constant 0 : i32
    %c0_i32_1 = arith.constant 0 : i32
    return %arg0, %c0_i32, %c0_i32_0 : i32, i32, i32
  }
  func.func @transform_5(%arg0: i32) -> (i32, i32, i32) {
    %c0_i32 = arith.constant 0 : i32
    %c0_i32_0 = arith.constant 0 : i32
    %c0_i32_1 = arith.constant 0 : i32
    return %arg0, %c0_i32, %c0_i32_0 : i32, i32, i32
  }
}

</mosaic_0001>

<bundles_post_ra>
// kernel: tpu_custom_call.1
= control target key start
LH: loop header
LB: loop body
LE: loop exit
PB: predicated region body
PF: predicated region fallthrough
CT: control target
= control target key end

     0   :  { %11 = vsyncpa [#allocation3], 0  ;;  %s765_s0 = inlined_call_operand.vmem [shape: f32[8,20], index: 0, kind: input, shape index: {}]   ;;  %s766_s1 = inlined_call_operand.vmem [shape: f32[8,24], index: 1, kind: input, shape index: {}]   ;;  %s767_s2 = inlined_call_operand.vmem [shape: f32[2,20,16], index: 2, kind: input, shape index: {}]   ;;  %s768_s3 = inlined_call_operand.vmem [shape: f32[2,24,24], index: 3, kind: input, shape index: {}]   ;;  %s769_s4 = inlined_call_operand.hbm [shape: f32[2,8,16], index: 4, kind: output, shape index: {0}]   ;;  %s770_s5 = inlined_call_operand.hbm [shape: f32[2,8,24], index: 5, kind: output, shape index: {1}]  }
   0x1   :  { %13 = vsyncpa [#allocation3 + $0x1], 0 }
   0x2   :  { %14 = vsyncpa [#allocation5], 0 }
   0x3   :  { %16 = vsyncpa [#allocation5 + $0x1], 0  ;;  %s644_s18 = smov 0   ;;  %s646_s19 = smov 0  }
   0x4   :  { %s648_s20 = smov 0   ;;  %s650_s21 = smov 0  }
   0x5 LB: > { %s665_s22 = sadd.s32 4294967295, %s612_s21   ;;  %s456_s23 = sadd.s32 4294967294, %s612_s21   ;;  %s612_s21 = sphi %s650_s21, %s776_s21   ;;  %s608_s20 = sphi %s648_s20, %s775_s20   ;;  %s604_s19 = sphi %s646_s19, %s774_s19   ;;  %s600_s18 = sphi %s644_s18, %s773_s18  }
   0x6   : > { %s669_s24 = sadd.s32 1, %s612_s21   ;;  %s123_s25 = sadd.s32 1, %s608_s20 }
   0x7   : > { %s120_s26 = ssub.s32 %s612_s21, %s669_s24  ;;  %p133_p0 = scmp.ne.s32.totalorder %s608_s20, %s604_s19 }
   0x8   : > { %p121_p1 = scmp.eq.s32.totalorder %s120_s26, 0  ;;  %p134_p2 = scmp.eq.s32.totalorder %s665_s22, 1 }
   0x9   : > { %p139_p3 = scmp.ne.s32.totalorder %s604_s19, %s600_s18  ;;  %p140_p4 = scmp.eq.s32.totalorder %s456_s23, 1 }
   0xa   : > { %s680_s27 = scalar_select %p121_p1, %s608_s20, %s123_s25  }
   0xb   : > { %p682_p5 = por %p134_p2, %p133_p0  ;;  %p686_p6 = por %p140_p4, %p139_p3 }
   0xc   : > { %p459_p7 = scmp.ge.s32.totalorder %s612_s21, 1  ;;  %p206_p8 = scmp.lt.s32.totalorder %s612_s21, 3 }
   0xe   : > { %p207_p9 = pnand %p459_p7, %p206_p8 }
   0xf   : > { %p244_p10 = scmp.lt.s32.totalorder (!%p207_p9), %s665_s22, 1  ;;  %s708_s17 = sand.u32 (!%p207_p9), 1, %s604_s19  }
  0x10   : > { %210 = sbr.rel (%p207_p9) target bundleno = 174 (0xae), region = 36  ;;  %s460_s23 = sshll.u32 (!%p207_p9), %s708_s17, 3 }
  0x11   : > { %s469_s25 = sshll.u32 (!%p207_p9), %s665_s22, 3  ;;  %s236_s10 = scalar_lea.vmem (!%p207_p9), [#allocation2], %s460_s23 }
  0x12   : > { %s335_s11 = sshll.u32 (!%p207_p9), %s236_s10, 4  ;;  %s243_s13 = scalar_lea.vmem (!%p207_p9), [#allocation4], %s460_s23  ;;  %s336_s11 = int_to_ptr.vmem [resolvable:$true] %s335_s11 }
  0x13   : > { %s349_s14 = sshll.u32 (!%p207_p9), %s243_s13, 4  ;;  %s718_s14 = int_to_ptr.vmem [resolvable:$true] %s349_s14 }
  0x15   : > { %s245_s30 = scalar_select %p244_p10, %s665_s22, 1  ;;  %vm262_vm0 = vcmask 1043456   ;;  %v254_v6 = vld [vmem:[%s765_s0] sm:$0xff]  ;;  %vm258_vm1 = vcmask 162816   ;;  %vm292_vm2 = vcmask 195584   ;;  %vm286_vm3 = vcmask 130048  }
  0x16   : > { %v288_v7 = vld [vmem:[%s766_s1] sm:$0xff]  ;;  %s318_s22 = scalar_lea.sflag [#allocation3], %s708_s17 }
  0x17   : > { %s473_s6 = smul.u32 24, %s245_s30  ;;  %s538_s30 = scalar_lea.hbm %s769_s4, 16 }
  0x19   : > { %s248_s9 = scalar_lea.vmem %s767_s2, %s473_s6  ;;  %s253_s12 = scalar_lea.vmem %s768_s3, %s473_s6 }
  0x1a   : > { %v257_v0 = vld [vmem:[%s248_s9 + $0x10] sm:$0xf]  ;;  %v256_v2 = vld [vmem:[%s248_s9 + $0x8] sm:$0xff]  ;;  %v255_v4 = vld [vmem:[%s248_s9] sm:$0xff]  ;;  %s333_s6 = scalar_lea.hbm %s769_s4, %s469_s25  ;;  %s347_s9 = scalar_lea.hbm %s770_s5, %s469_s25 }
  0x1b   : > { %v291_v1 = vld [vmem:[%s253_s12 + $0x10] sm:$0xff]  ;;  %464 = vmatpush.msk.msra.mxu0 %vm262_vm0, %v257_v0  ;;  %v290_v3 = vld [vmem:[%s253_s12 + $0x8] sm:$0xff]  ;;  %v289_v5 = vld [vmem:[%s253_s12] sm:$0xff]  ;;  %s337_s12 = sshll.u32 %s333_s6, 4  ;;  %s351_s15 = sshll.u32 %s347_s9, 4  ;;  %s338_s12 = int_to_ptr.hbm [resolvable:$true] %s337_s12  ;;  %s720_s15 = int_to_ptr.hbm [resolvable:$true] %s351_s15 }
  0x1c   : > { %309 = vmatpush.msra.mxu1 %v291_v1  ;;  %s532_s16 = sshra.s32 %s338_s12, 4  ;;  %s533_s16 = int_to_ptr.hbm [resolvable:$true] %s532_s16 }
  0x1d   : > { %280 = vmatpush.msra.mxu0 %v256_v2  ;;  %s534_s25 = scalar_lea.hbm %s533_s16, 8  ;;  %p539_p0 = scmp.lt.s32.totalorder %s533_s16, %s769_s4 }
  0x1e   : > { %310 = vmatpush.msra.mxu1 %v290_v3  ;;  %p535_p11 = scmp.ne.s32.totalorder %s533_s16, %s534_s25  ;;  %p540_p1 = scmp.lt.s32.totalorder %s538_s30, %s534_s25 }
  0x1f   : > { %281 = vmatpush.msra.mxu0 %v255_v4 }
  0x20   : > { %311 = vmatpush.msra.mxu1 %v289_v5  ;;  %465 = vmatmul.msk.f32.vlgmr.msra.gmra.mxu0 %vm258_vm1, %v254_v6  ;;  %p536_p12 = pnand %p535_p11, %p682_p5  ;;  %p541_p2 = por %p540_p1, %p539_p0 }
  0x21   : > { %466 = vmatmul.msk.f32.vlgmr.msra.gmra.mxu1 %vm292_vm2, %v288_v7 }
  0x22   : > { %p537_p13 = pneg %p536_p12 }
  0x24   : > { %p542_p3 = pnand %p541_p2, %p537_p13 }
  0x9d   : > { %v283_v8 = vpop.f32.mrf.mxu0 }
  0x9e   : > { %v313_v9 = vpop.f32.mrf.mxu1  ;;  %287 = vst.msk [vmem:[%s236_s10] sm:$0xff] %vm286_vm3, %v283_v8 }
  0x9f   : > { %316 = vst.msk [vmem:[%s243_s13] sm:$0xff] %vm292_vm2, %v313_v9 }
  0xa0   : > { %545 = shalt.err (!%p542_p3)
}
  0xa1   : > { %474 = dma.vmem_to_hbm [thread:$0]  (%p682_p5), %s336_s11, 128, %s338_s12, %s318_s22  }
  0xa2   : > { %s323_s8 = scalar_lea.sflag [#allocation5], %s708_s17  ;;  %s560_s9 = sshra.s32 %s720_s15, 4  ;;  %s561_s9 = int_to_ptr.hbm [resolvable:$true] %s560_s9 }
  0xa3   : > { %s562_s10 = scalar_lea.hbm %s561_s9, 8  ;;  %s566_s25 = scalar_lea.hbm %s770_s5, 16 }
  0xa4   : > { %p563_p4 = scmp.ne.s32.totalorder %s561_s9, %s562_s10  ;;  %p567_p9 = scmp.lt.s32.totalorder %s561_s9, %s770_s5 }
  0xa5   : > { %p568_p10 = scmp.lt.s32.totalorder %s566_s25, %s562_s10 }
  0xa6   : > { %p564_p7 = pnand %p563_p4, %p682_p5 }
  0xa7   : > { %p569_p11 = por %p568_p10, %p567_p9 }
  0xa8   : > { %p565_p8 = pneg %p564_p7 }
  0xaa   : > { %p570_p12 = pnand %p569_p11, %p565_p8 }
  0xac   : > { %573 = shalt.err (!%p570_p12)
}
  0xad   : > { %475 = dma.vmem_to_hbm [thread:$0]  (%p682_p5), %s718_s14, 128, %s720_s15, %s323_s8  }
  0xae PF: > { %p485_p13 = scmp.ge.s32.totalorder %s612_s21, 2  ;;  %s363_s17 = sand.u32 1, %s600_s18  }
  0xaf   : > { %s364_s11 = scalar_lea.sflag [#allocation3], %s363_s17 }
  0xb0   : > { %p479_p0 = pnand %p485_p13, %p686_p6 }
  0xb2   : > { %p480_p1 = pneg %p479_p0 }
  0xb4   : > { %591 = dma.done.wait (%p480_p1), %s364_s11, 128  }
  0xb5   : > { %593 = vsyncadd (%p480_p1), %s364_s11, 4294967168  ;;  %s374_s12 = scalar_lea.sflag [#allocation5], %s363_s17 }
  0xb6   : > { %595 = dma.done.wait (%p480_p1), %s374_s12, 128  }
  0xb7   : > { %597 = vsyncadd (%p480_p1), %s374_s12, 4294967168  ;;  %p19_p5 = scmp.ge.s32.totalorder %s669_s24, 4   ;;  %s773_s18 = smov %s604_s19 }
  0xb8   : > { %s774_s19 = smov %s608_s20  ;;  %s775_s20 = smov %s680_s27 }
  0xb9   : > { %s776_s21 = smov %s669_s24  ;;  %21 = sbr.rel (!%p19_p5) target bundleno = 5 (0x5), region = 91 }
  0xbe   :  { %380 = vsyncpa [#allocation3], 1 }
  0xbf   :  { %382 = vsyncpa [#allocation3 + $0x1], 1 }
  0xc0   :  { %383 = vsyncpa [#allocation5], 1 }
  0xc1   :  { %385 = vsyncpa [#allocation5 + $0x1], 1 }

</bundles_post_ra>
